<compile_context>
chip_gen: v5e
topology: v5e:2x2
jax: 0.10.0
libtpu: 0.0.40
codegen_flags: <defaults>
</compile_context>

<pallas_src>
import math

import jax
import jax.numpy as jnp
from jax import lax
from jax.experimental import pallas as pl
from jax.experimental.pallas import tpu as pltpu

BN_EPS = 1e-5
INV_SQRT2 = 1.0 / math.sqrt(2.0)
FEAT = 1280        # backbone feature width
HID = 32           # classifier hidden width
NCLS = 3           # real classes
NCLS_PAD = 128     # lane-dense padded class dim
NEG_BIG = -1e30    # logit for padded classes -> exp underflows to exactly 0


def _round_up(x, m):
    return ((x + m - 1) // m) * m


def _vmem_budget():
    """Generation-aware VMEM budget (bytes) for this kernel's working set."""
    cap = 64 * 1024 * 1024  # conservative default = v7x per-TC VMEM
    try:
        info = pltpu.get_tpu_info()
        cap = int(getattr(info, "vmem_capacity_bytes", cap))
    except Exception:
        pass
    # Leave headroom for compiler scratch: v7x (64 MiB) -> 48 MiB budget,
    # v5e/v6e (128 MiB) -> 64 MiB budget.
    return max(16 << 20, min(cap - (16 << 20), 64 << 20))


def _pick_tile(B, vmem_budget, requested=2048):
    """Largest batch tile (multiple of 16) that fits the VMEM budget."""
    if B <= 16:
        return _round_up(B, 8)                 # tiny batch: one exact block
    # Double-buffered f32 x tile + f32 out tile per row (conservative bound),
    # plus ~2 MiB reserved for the VMEM-resident weights / misc.
    per_row = 2 * (FEAT * 4 + NCLS_PAD * 4)
    fit = max(16, (vmem_budget - (2 << 20)) // per_row)
    half = -(-B // 2)                          # keep >= 2 grid steps (v7x 2 TCs)
    tb = min(requested, 4096, fit, half)
    return max(16, (tb // 16) * 16)


def _head_kernel(x_ref, w1_ref, b1_ref, w2_ref, b2_ref, out_ref):
    # x: [TB, 1280] backbone dtype (cast to bf16 here; no separate HBM convert)
    # w1 (BN-folded): [1280, 32] bf16 ; b1: [1, 32] f32
    # w2 (class-padded): [32, 128] bf16 ; b2: [1, 128] f32 ; out: [TB, 128] f32
    x = x_ref[...].astype(jnp.bfloat16)
    h = jnp.dot(x, w1_ref[...], preferred_element_type=jnp.float32) + b1_ref[...]

    # GELU (exact erf form — PyTorch nn.GELU() default)
    h = 0.5 * h * (1.0 + lax.erf(h * INV_SQRT2))

    # Linear(32 -> 3) into a 128-wide lane-dense padded logit slab (bf16 MXU)
    logits = jnp.dot(h.astype(jnp.bfloat16), w2_ref[...],
                     preferred_element_type=jnp.float32) + b2_ref[...]

    # Softmax over the class axis; padded classes carry -1e30 -> probability 0.
    # Exact divide (not approx reciprocal) so each row sums to 1; the divide is
    # hidden under the x-tile DMA on all generations.
    m = jnp.max(logits, axis=1, keepdims=True)
    e = jnp.exp(logits - m)
    out_ref[...] = e / jnp.sum(e, axis=1, keepdims=True)


def trading_head_forward(x, params, *, tb=2048):
    """x: [B, 1280] backbone features. Returns [B, 3] softmax probabilities."""
    B = x.shape[0]

    # --- fold BatchNorm1d (running stats, eval semantics) into the first Linear ---
    scale = params["gamma"] * lax.rsqrt(params["running_var"] + BN_EPS)      # [32]
    w1f = (params["w1"] * scale[None, :]).astype(jnp.bfloat16)               # [1280,32]
    b1f = ((params["b1"] - params["running_mean"]) * scale
           + params["beta"]).reshape(1, HID).astype(jnp.float32)             # [1,32]

    # --- pad the class dim so the output / softmax are lane-dense ---
    w2p = (jnp.zeros((HID, NCLS_PAD), jnp.float32)
           .at[:, :NCLS].set(params["w2"])).astype(jnp.bfloat16)             # [32,128]
    b2p = jnp.full((1, NCLS_PAD), NEG_BIG, jnp.float32).at[0, :NCLS].set(params["b2"])

    # --- generation-aware tiling (no jnp.pad: ragged tail handled by Pallas) ---
    budget = _vmem_budget()
    tb = _pick_tile(B, budget, requested=tb)
    grid = (pl.cdiv(B, tb),)

    need = (2 * tb * (FEAT * x.dtype.itemsize + NCLS_PAD * 4)
            + 2 * (FEAT * HID * 2 + HID * NCLS_PAD * 2 + (HID + NCLS_PAD) * 4))
    vmem_limit = int(max(16 << 20, min(budget, need + (4 << 20))))

    cost = pl.CostEstimate(
        flops=2 * B * (FEAT * HID + HID * NCLS_PAD),
        transcendentals=B * (HID + NCLS_PAD),
        bytes_accessed=B * (FEAT * x.dtype.itemsize + NCLS_PAD * 4)
        + FEAT * HID * 2 + HID * NCLS_PAD * 2,
    )

    out = pl.pallas_call(
        _head_kernel,
        out_shape=jax.ShapeDtypeStruct((B, NCLS_PAD), jnp.float32),
        grid=grid,
        in_specs=[
            pl.BlockSpec((tb, FEAT), lambda i: (i, 0)),         # streamed per-tile
            pl.BlockSpec((FEAT, HID), lambda i: (0, 0)),        # VMEM-resident weights
            pl.BlockSpec((1, HID), lambda i: (0, 0)),
            pl.BlockSpec((HID, NCLS_PAD), lambda i: (0, 0)),
            pl.BlockSpec((1, NCLS_PAD), lambda i: (0, 0)),
        ],
        out_specs=pl.BlockSpec((tb, NCLS_PAD), lambda i: (i, 0)),
        compiler_params=pltpu.CompilerParams(
            dimension_semantics=("parallel",),   # shards batch across v7x's 2 TCs
            vmem_limit_bytes=vmem_limit,         # explicit (v5e scoped default is 16 MiB)
        ),
        cost_estimate=cost,
    )(x, w1f, b1f, w2p, b2p)

    # NOTE: downstream consumers that can read the lane-dense padded slab
    # directly should do so (or slice inside their own jit) to avoid this
    # extra small HBM pass.
    return out[:, :NCLS]


def init_params(key):
    """Deterministic synthetic parameters with the module's shapes."""
    k1, k2, k3, k4, k5, k6 = jax.random.split(key, 6)
    lim1 = 1.0 / math.sqrt(FEAT)
    lim2 = 1.0 / math.sqrt(HID)
    return {
        "w1": jax.random.uniform(k1, (FEAT, HID), jnp.float32, -lim1, lim1),
        "b1": jax.random.uniform(k2, (HID,), jnp.float32, -lim1, lim1),
        # BatchNorm1d affine + running stats (eval-mode semantics)
        "gamma": jnp.ones((HID,), jnp.float32),
        "beta": jnp.zeros((HID,), jnp.float32),
        "running_mean": 0.1 * jax.random.normal(k5, (HID,), jnp.float32),
        "running_var": jax.random.uniform(k6, (HID,), jnp.float32, 0.5, 1.5),
        "w2": jax.random.uniform(k3, (HID, NCLS), jnp.float32, -lim2, lim2),
        "b2": jax.random.uniform(k4, (NCLS,), jnp.float32, -lim2, lim2),
    }


def _reference(x, p):
    """Full-f32 eval-mode module semantics (Linear -> BN(eval) -> GELU -> Linear -> softmax)."""
    h = jnp.dot(x, p["w1"], precision=lax.Precision.HIGHEST) + p["b1"]
    h = (h - p["running_mean"]) / jnp.sqrt(p["running_var"] + BN_EPS) * p["gamma"] + p["beta"]
    h = 0.5 * h * (1.0 + lax.erf(h * INV_SQRT2))
    logits = jnp.dot(h, p["w2"], precision=lax.Precision.HIGHEST) + p["b2"]
    return jax.nn.softmax(logits, axis=1)


if __name__ == "__main__":
    key = jax.random.PRNGKey(0)
    kx, kx2, kp = jax.random.split(key, 3)
    params = init_params(kp)

    fwd = jax.jit(trading_head_forward)

    # Small batch: single exact block.
    B = 8
    x = jax.random.normal(kx, (B, FEAT), jnp.float32)   # backbone feature output
    out = jax.block_until_ready(fwd(x, params))
    ref = _reference(x, params)

    assert out.shape == (B, NCLS)
    assert bool(jnp.all(jnp.isfinite(out)))
    # exact divide in the softmax -> rows sum to 1 to f32 precision
    assert jnp.allclose(jnp.sum(out, axis=1), 1.0, atol=1e-4)
    # bf16 inputs/weights (f32 accumulation) vs full-f32 reference
    assert jnp.allclose(out, ref, atol=4e-3, rtol=0.0)

    # Ragged batch: exercises the no-pad path (partial final block masked by Pallas).
    B2 = 20
    x2 = jax.random.normal(kx2, (B2, FEAT), jnp.float32)
    out2 = jax.block_until_ready(fwd(x2, params))
    ref2 = _reference(x2, params)
    assert out2.shape == (B2, NCLS)
    assert bool(jnp.all(jnp.isfinite(out2)))
    assert jnp.allclose(jnp.sum(out2, axis=1), 1.0, atol=1e-4)
    assert jnp.allclose(out2, ref2, atol=4e-3, rtol=0.0)

    print("KERNEL_OK")
</pallas_src>

<mosaic_0001>
module attributes {stable_mosaic.version = 11 : i64} {
  func.func @_head_kernel(%arg0: i32, %arg1: memref<8x1280xf32, #tpu.memory_space<vmem>>, %arg2: memref<1280x32xbf16, #tpu.memory_space<vmem>>, %arg3: memref<1x32xf32, #tpu.memory_space<vmem>>, %arg4: memref<32x128xbf16, #tpu.memory_space<vmem>>, %arg5: memref<1x128xf32, #tpu.memory_space<vmem>>, %arg6: memref<8x128xf32, #tpu.memory_space<vmem>>) attributes {dimension_semantics = [#tpu.dimension_semantics<parallel>], iteration_bounds = array<i64: 1>, scalar_prefetch = 0 : i64, scratch_operands = 0 : i64, tpu.core_type = #tpu.core_type<tc>, window_params = [{transform_indices = @transform_0, window_bounds = array<i64: 8, 1280>}, {pipeline_mode = #tpu.pipeline_mode<synchronous>, transform_indices = @transform_1, window_bounds = array<i64: 1280, 32>}, {pipeline_mode = #tpu.pipeline_mode<synchronous>, transform_indices = @transform_2, window_bounds = array<i64: 1, 32>}, {pipeline_mode = #tpu.pipeline_mode<synchronous>, transform_indices = @transform_3, window_bounds = array<i64: 32, 128>}, {pipeline_mode = #tpu.pipeline_mode<synchronous>, transform_indices = @transform_4, window_bounds = array<i64: 1, 128>}, {transform_indices = @transform_5, window_bounds = array<i64: 8, 128>}]} {
    %c0 = arith.constant 0 : index
    %c0_0 = arith.constant 0 : index
    %0 = vector.load %arg1[%c0, %c0_0] : memref<8x1280xf32, #tpu.memory_space<vmem>>, vector<8x1280xf32>
    %1 = arith.truncf %0 : vector<8x1280xf32> to vector<8x1280xbf16>
    %c0_1 = arith.constant 0 : index
    %c0_2 = arith.constant 0 : index
    %2 = vector.load %arg2[%c0_1, %c0_2] : memref<1280x32xbf16, #tpu.memory_space<vmem>>, vector<1280x32xbf16>
    %cst = arith.constant dense<0.000000e+00> : vector<8x32xf32>
    %3 = tpu.matmul %1, %2, %cst {dimension_numbers = #tpu.dot_dimension_numbers<[1], [0], [0], [1], [0, 0, 1, 1], [], []>} : vector<8x1280xbf16>, vector<1280x32xbf16>, vector<8x32xf32> -> vector<8x32xf32>
    %c0_3 = arith.constant 0 : index
    %c0_4 = arith.constant 0 : index
    %4 = vector.load %arg3[%c0_3, %c0_4] : memref<1x32xf32, #tpu.memory_space<vmem>>, vector<1x32xf32>
    %5 = vector.broadcast %4 : vector<1x32xf32> to vector<8x32xf32>
    %6 = arith.addf %3, %5 : vector<8x32xf32>
    %cst_5 = arith.constant 5.000000e-01 : f32
    %7 = vector.broadcast %cst_5 : f32 to vector<8x32xf32>
    %8 = arith.mulf %7, %6 : vector<8x32xf32>
    %cst_6 = arith.constant 0.707106769 : f32
    %9 = vector.broadcast %cst_6 : f32 to vector<8x32xf32>
    %10 = arith.mulf %6, %9 : vector<8x32xf32>
    %11 = math.erf %10 : vector<8x32xf32>
    %cst_7 = arith.constant 1.000000e+00 : f32
    %12 = vector.broadcast %cst_7 : f32 to vector<8x32xf32>
    %13 = arith.addf %12, %11 : vector<8x32xf32>
    %14 = arith.mulf %8, %13 : vector<8x32xf32>
    %15 = arith.truncf %14 : vector<8x32xf32> to vector<8x32xbf16>
    %c0_8 = arith.constant 0 : index
    %c0_9 = arith.constant 0 : index
    %16 = vector.load %arg4[%c0_8, %c0_9] : memref<32x128xbf16, #tpu.memory_space<vmem>>, vector<32x128xbf16>
    %cst_10 = arith.constant dense<0.000000e+00> : vector<8x128xf32>
    %17 = tpu.matmul %15, %16, %cst_10 {dimension_numbers = #tpu.dot_dimension_numbers<[1], [0], [0], [1], [0, 0, 1, 1], [], []>} : vector<8x32xbf16>, vector<32x128xbf16>, vector<8x128xf32> -> vector<8x128xf32>
    %c0_11 = arith.constant 0 : index
    %c0_12 = arith.constant 0 : index
    %18 = vector.load %arg5[%c0_11, %c0_12] : memref<1x128xf32, #tpu.memory_space<vmem>>, vector<1x128xf32>
    %19 = vector.broadcast %18 : vector<1x128xf32> to vector<8x128xf32>
    %20 = arith.addf %17, %19 : vector<8x128xf32>
    %cst_13 = arith.constant dense<0xFF800000> : vector<8xf32>
    %21 = vector.multi_reduction <maximumf>, %20, %cst_13 [1] : vector<8x128xf32> to vector<8xf32>
    %22 = vector.shape_cast %21 : vector<8xf32> to vector<8x1xf32>
    %23 = vector.broadcast %22 : vector<8x1xf32> to vector<8x128xf32>
    %24 = arith.subf %20, %23 : vector<8x128xf32>
    %25 = math.exp %24 : vector<8x128xf32>
    %cst_14 = arith.constant dense<0.000000e+00> : vector<8xf32>
    %26 = vector.multi_reduction <add>, %25, %cst_14 [1] : vector<8x128xf32> to vector<8xf32>
    %27 = vector.shape_cast %26 : vector<8xf32> to vector<8x1xf32>
    %28 = vector.broadcast %27 : vector<8x1xf32> to vector<8x128xf32>
    %29 = arith.divf %25, %28 : vector<8x128xf32>
    %c0_15 = arith.constant 0 : index
    %c0_16 = arith.constant 0 : index
    %30 = vector.load %arg6[%c0_15, %c0_16] : memref<8x128xf32, #tpu.memory_space<vmem>>, vector<8x128xf32>
    tpu.vector_store %arg6[%c0_15, %c0_16], %29 {strides = array<i32>} : memref<8x128xf32, #tpu.memory_space<vmem>>, vector<8x128xf32>,
    return
  }
  func.func @transform_0(%arg0: i32) -> (i32, i32) {
    %c0_i32 = arith.constant 0 : i32
    %c0_i32_0 = arith.constant 0 : i32
    return %arg0, %c0_i32 : i32, i32
  }
  func.func @transform_1(%arg0: i32) -> (i32, i32) {
    %c0_i32 = arith.constant 0 : i32
    %c0_i32_0 = arith.constant 0 : i32
    %c0_i32_1 = arith.constant 0 : i32
    return %c0_i32, %c0_i32_0 : i32, i32
  }
  func.func @transform_2(%arg0: i32) -> (i32, i32) {
    %c0_i32 = arith.constant 0 : i32
    %c0_i32_0 = arith.constant 0 : i32
    %c0_i32_1 = arith.constant 0 : i32
    return %c0_i32, %c0_i32_0 : i32, i32
  }
  func.func @transform_3(%arg0: i32) -> (i32, i32) {
    %c0_i32 = arith.constant 0 : i32
    %c0_i32_0 = arith.constant 0 : i32
    %c0_i32_1 = arith.constant 0 : i32
    return %c0_i32, %c0_i32_0 : i32, i32
  }
  func.func @transform_4(%arg0: i32) -> (i32, i32) {
    %c0_i32 = arith.constant 0 : i32
    %c0_i32_0 = arith.constant 0 : i32
    %c0_i32_1 = arith.constant 0 : i32
    return %c0_i32, %c0_i32_0 : i32, i32
  }
  func.func @transform_5(%arg0: i32) -> (i32, i32) {
    %c0_i32 = arith.constant 0 : i32
    %c0_i32_0 = arith.constant 0 : i32
    return %arg0, %c0_i32 : i32, i32
  }
}

</mosaic_0001>

<bundles_post_ra>
// kernel: trading_head_forward.1
= control target key start
LH: loop header
LB: loop body
LE: loop exit
PB: predicated region body
PF: predicated region fallthrough
CT: control target
= control target key end

     0   :  { %vm880_vm4 = vcmask 261120   ;;  %s1659_s1 = inlined_call_operand.vmem [shape: bf16[1280,32], index: 1, kind: input, shape index: {}]   ;;  %s1660_s2 = inlined_call_operand.vmem [shape: f32[1,32], index: 2, kind: input, shape index: {}]   ;;  %s1661_s0 = inlined_call_operand.vmem [shape: f32[8,1280], index: 0, kind: input, shape index: {}]   ;;  %s1662_s4 = inlined_call_operand.vmem [shape: f32[1,128], index: 4, kind: input, shape index: {}]   ;;  %s1663_s3 = inlined_call_operand.vmem [shape: bf16[32,128], index: 3, kind: input, shape index: {}]   ;;  %s1664_s5 = inlined_call_operand.vmem [shape: f32[8,128], index: 5, kind: output, shape index: {}]  }
   0x1   :  { %v1261_v0 = vld [vmem:[%s1659_s1 + $0x38] sm:$0xff]  ;;  %v1260_v4 = vld [vmem:[%s1659_s1 + $0x30] sm:$0xff]  ;;  %v1259_v8 = vld [vmem:[%s1659_s1 + $0x28] sm:$0xff] }
   0x2   :  { %v1269_v1 = vld [vmem:[%s1659_s1 + $0x78] sm:$0xff]  ;;  %685 = vmatpush.bf16.msra.mxu0 %v1261_v0  ;;  %v1268_v5 = vld [vmem:[%s1659_s1 + $0x70] sm:$0xff]  ;;  %v1267_v9 = vld [vmem:[%s1659_s1 + $0x68] sm:$0xff] }
   0x3   :  { %v1277_v2 = vld [vmem:[%s1659_s1 + $0xb8] sm:$0xff]  ;;  %698 = vmatpush.bf16.msra.mxu1 %v1269_v1  ;;  %v1276_v6 = vld [vmem:[%s1659_s1 + $0xb0] sm:$0xff]  ;;  %v1275_v10 = vld [vmem:[%s1659_s1 + $0xa8] sm:$0xff] }
   0x4   :  { %v1285_v3 = vld [vmem:[%s1659_s1 + $0xf8] sm:$0xff]  ;;  %711 = vmatpush.bf16.msra.mxu2 %v1277_v2  ;;  %v1284_v7 = vld [vmem:[%s1659_s1 + $0xf0] sm:$0xff]  ;;  %v1283_v11 = vld [vmem:[%s1659_s1 + $0xe8] sm:$0xff] }
   0x5   :  { %724 = vmatpush.bf16.msra.mxu3 %v1285_v3  ;;  %v1258_v12 = vld [vmem:[%s1659_s1 + $0x20] sm:$0xff]  ;;  %v1257_v16 = vld [vmem:[%s1659_s1 + $0x18] sm:$0xff]  ;;  %v1256_v20 = vld [vmem:[%s1659_s1 + $0x10] sm:$0xff] }
   0x6   :  { %686 = vmatpush.bf16.msra.mxu0 %v1260_v4  ;;  %v1266_v13 = vld [vmem:[%s1659_s1 + $0x60] sm:$0xff]  ;;  %v1265_v17 = vld [vmem:[%s1659_s1 + $0x58] sm:$0xff]  ;;  %v1264_v21 = vld [vmem:[%s1659_s1 + $0x50] sm:$0xff] }
   0x7   :  { %699 = vmatpush.bf16.msra.mxu1 %v1268_v5  ;;  %v1274_v14 = vld [vmem:[%s1659_s1 + $0xa0] sm:$0xff]  ;;  %v1273_v18 = vld [vmem:[%s1659_s1 + $0x98] sm:$0xff]  ;;  %v1272_v22 = vld [vmem:[%s1659_s1 + $0x90] sm:$0xff] }
   0x8   :  { %712 = vmatpush.bf16.msra.mxu2 %v1276_v6  ;;  %v1282_v15 = vld [vmem:[%s1659_s1 + $0xe0] sm:$0xff]  ;;  %v1281_v19 = vld [vmem:[%s1659_s1 + $0xd8] sm:$0xff]  ;;  %v1280_v23 = vld [vmem:[%s1659_s1 + $0xd0] sm:$0xff] }
   0x9   :  { %725 = vmatpush.bf16.msra.mxu3 %v1284_v7  ;;  %v1255_v24 = vld [vmem:[%s1659_s1 + $0x8] sm:$0xff]  ;;  %v1254_v28 = vld [vmem:[%s1659_s1] sm:$0xff]  ;;  %v1293_v30 = vld [vmem:[%s1659_s1 + $0x138] sm:$0xff] }
   0xa   :  { %687 = vmatpush.bf16.msra.mxu0 %v1259_v8  ;;  %v1263_v25 = vld [vmem:[%s1659_s1 + $0x48] sm:$0xff]  ;;  %v1262_v29 = vld [vmem:[%s1659_s1 + $0x40] sm:$0xff]  ;;  %v1301_v31 = vld [vmem:[%s1659_s1 + $0x178] sm:$0xff] }
   0xb   :  { %700 = vmatpush.bf16.msra.mxu1 %v1267_v9  ;;  %v1271_v26 = vld [vmem:[%s1659_s1 + $0x88] sm:$0xff]  ;;  %v21_v32 = vld [vmem:[%s1661_s0] sm:$0xff]  ;;  %v1309_v35 = vld [vmem:[%s1659_s1 + $0x1b8] sm:$0xff] }
   0xc   :  { %713 = vmatpush.bf16.msra.mxu2 %v1275_v10  ;;  %v1279_v27 = vld [vmem:[%s1659_s1 + $0xc8] sm:$0xff]  ;;  %v1270_v34 = vld [vmem:[%s1659_s1 + $0x80] sm:$0xff]  ;;  %v1317_v37 = vld [vmem:[%s1659_s1 + $0x1f8] sm:$0xff]  ;;  %v31_v40 = vpack.c.bf16 %v21_v32, %v21_v32 }
   0xd   :  { %726 = vmatpush.bf16.msra.mxu3 %v1283_v11  ;;  %v22_v33 = vld [vmem:[%s1661_s0 + $0x8] sm:$0xff]  ;;  %v1278_v36 = vld [vmem:[%s1659_s1 + $0xc0] sm:$0xff]  ;;  %v23_v38 = vld [vmem:[%s1661_s0 + $0x10] sm:$0xff] }
   0xe   :  { %688 = vmatpush.bf16.msra.mxu0 %v1258_v12  ;;  %v24_v39 = vld [vmem:[%s1661_s0 + $0x18] sm:$0xff]  ;;  %v32_v41 = vpack.c.bf16 %v22_v33, %v22_v33  ;;  %v1292_v42 = vld [vmem:[%s1659_s1 + $0x130] sm:$0xff]  ;;  %v33_v44 = vpack.c.bf16 %v23_v38, %v23_v38  ;;  %v1291_v48 = vld [vmem:[%s1659_s1 + $0x128] sm:$0xff] }
   0xf   :  { %701 = vmatpush.bf16.msra.mxu1 %v1266_v13  ;;  %v1300_v43 = vld [vmem:[%s1659_s1 + $0x170] sm:$0xff]  ;;  %v34_v45 = vpack.c.bf16 %v24_v39, %v24_v39  ;;  %v1299_v49 = vld [vmem:[%s1659_s1 + $0x168] sm:$0xff]  ;;  %v1290_v52 = vld [vmem:[%s1659_s1 + $0x120] sm:$0xff] }
  0x10   :  { %714 = vmatpush.bf16.msra.mxu2 %v1274_v14  ;;  %v1308_v46 = vld [vmem:[%s1659_s1 + $0x1b0] sm:$0xff]  ;;  %v1307_v50 = vld [vmem:[%s1659_s1 + $0x1a8] sm:$0xff]  ;;  %v1298_v53 = vld [vmem:[%s1659_s1 + $0x160] sm:$0xff] }
  0x11   :  { %727 = vmatpush.bf16.msra.mxu3 %v1282_v15  ;;  %v1316_v47 = vld [vmem:[%s1659_s1 + $0x1f0] sm:$0xff]  ;;  %v1315_v51 = vld [vmem:[%s1659_s1 + $0x1e8] sm:$0xff]  ;;  %v1306_v54 = vld [vmem:[%s1659_s1 + $0x1a0] sm:$0xff] }
  0x12   :  { %689 = vmatpush.bf16.msra.mxu0 %v1257_v16  ;;  %v1314_v55 = vld [vmem:[%s1659_s1 + $0x1e0] sm:$0xff]  ;;  %v1289_v56 = vld [vmem:[%s1659_s1 + $0x118] sm:$0xff]  ;;  %v1288_v60 = vld [vmem:[%s1659_s1 + $0x110] sm:$0xff] }
  0x13   :  { %702 = vmatpush.bf16.msra.mxu1 %v1265_v17  ;;  %v1297_v57 = vld [vmem:[%s1659_s1 + $0x158] sm:$0xff]  ;;  %v1296_v61 = vld [vmem:[%s1659_s1 + $0x150] sm:$0xff]  ;;  %v1287_v0 = vld [vmem:[%s1659_s1 + $0x108] sm:$0xff] }
  0x14   :  { %715 = vmatpush.bf16.msra.mxu2 %v1273_v18  ;;  %v1305_v58 = vld [vmem:[%s1659_s1 + $0x198] sm:$0xff]  ;;  %v1304_v62 = vld [vmem:[%s1659_s1 + $0x190] sm:$0xff]  ;;  %v1295_v1 = vld [vmem:[%s1659_s1 + $0x148] sm:$0xff] }
  0x15   :  { %728 = vmatpush.bf16.msra.mxu3 %v1281_v19  ;;  %v1313_v59 = vld [vmem:[%s1659_s1 + $0x1d8] sm:$0xff]  ;;  %v1312_v63 = vld [vmem:[%s1659_s1 + $0x1d0] sm:$0xff]  ;;  %v1303_v2 = vld [vmem:[%s1659_s1 + $0x188] sm:$0xff] }
  0x16   :  { %690 = vmatpush.bf16.msra.mxu0 %v1256_v20  ;;  %v1311_v3 = vld [vmem:[%s1659_s1 + $0x1c8] sm:$0xff]  ;;  %v1286_v4 = vld [vmem:[%s1659_s1 + $0x100] sm:$0xff]  ;;  %v1325_v8 = vld [vmem:[%s1659_s1 + $0x238] sm:$0xff] }
  0x17   :  { %703 = vmatpush.bf16.msra.mxu1 %v1264_v21  ;;  %v1294_v5 = vld [vmem:[%s1659_s1 + $0x140] sm:$0xff]  ;;  %v26_v7 = vld [vmem:[%s1661_s0 + $0x28] sm:$0xff]  ;;  %v1333_v9 = vld [vmem:[%s1659_s1 + $0x278] sm:$0xff] }
  0x18   :  { %716 = vmatpush.bf16.msra.mxu2 %v1272_v22  ;;  %v25_v6 = vld [vmem:[%s1661_s0 + $0x20] sm:$0xff]  ;;  %v27_v12 = vld [vmem:[%s1661_s0 + $0x30] sm:$0xff]  ;;  %v28_v14 = vld [vmem:[%s1661_s0 + $0x38] sm:$0xff]  ;;  %v36_v15 = vpack.c.bf16 %v26_v7, %v26_v7 }
  0x19   :  { %729 = vmatpush.bf16.msra.mxu3 %v1280_v23  ;;  %v1302_v10 = vld [vmem:[%s1659_s1 + $0x180] sm:$0xff]  ;;  %v35_v13 = vpack.c.bf16 %v25_v6, %v25_v6  ;;  %v1324_v16 = vld [vmem:[%s1659_s1 + $0x230] sm:$0xff]  ;;  %v37_v18 = vpack.c.bf16 %v27_v12, %v27_v12  ;;  %v38_v19 = vpack.c.bf16 %v28_v14, %v28_v14  ;;  %v1323_v20 = vld [vmem:[%s1659_s1 + $0x228] sm:$0xff] }
  0x1a   :  { %691 = vmatpush.bf16.msra.mxu0 %v1255_v24  ;;  %v1310_v11 = vld [vmem:[%s1659_s1 + $0x1c0] sm:$0xff]  ;;  %v1332_v17 = vld [vmem:[%s1659_s1 + $0x270] sm:$0xff]  ;;  %v1331_v21 = vld [vmem:[%s1659_s1 + $0x268] sm:$0xff] }
  0x1b   :  { %704 = vmatpush.bf16.msra.mxu1 %v1263_v25  ;;  %v1322_v22 = vld [vmem:[%s1659_s1 + $0x220] sm:$0xff]  ;;  %v1321_v24 = vld [vmem:[%s1659_s1 + $0x218] sm:$0xff]  ;;  %v30_v33 = vld [vmem:[%s1661_s0 + $0x48] sm:$0xff] }
  0x1c   :  { %717 = vmatpush.bf16.msra.mxu2 %v1271_v26  ;;  %v1330_v23 = vld [vmem:[%s1659_s1 + $0x260] sm:$0xff]  ;;  %v1329_v25 = vld [vmem:[%s1659_s1 + $0x258] sm:$0xff]  ;;  %v1320_v26 = vld [vmem:[%s1659_s1 + $0x210] sm:$0xff] }
  0x1d   :  { %730 = vmatpush.bf16.msra.mxu3 %v1279_v27  ;;  %v1328_v27 = vld [vmem:[%s1659_s1 + $0x250] sm:$0xff]  ;;  %v29_v32 = vld [vmem:[%s1661_s0 + $0x40] sm:$0xff]  ;;  %v1335_v14 = vld [vmem:[%s1663_s3 + $0x8] sm:$0xff] }
  0x1e   :  { %692 = vmatpush.bf16.msra.mxu0 %v1254_v28  ;;  %v1319_v28 = vld [vmem:[%s1659_s1 + $0x208] sm:$0xff] }
  0x1f   :  { %705 = vmatpush.bf16.msra.mxu1 %v1262_v29  ;;  %v1327_v29 = vld [vmem:[%s1659_s1 + $0x248] sm:$0xff] }
  0x20   :  { %718 = vmatpush.bf16.msra.mxu2 %v1270_v34  ;;  %v39_v34 = vpack.c.bf16 %v29_v32, %v29_v32 }
  0x21   :  { %731 = vmatpush.bf16.msra.mxu3 %v1278_v36  ;;  %693 = vmatmul.bf16.vlgmr.msra.gmra.mxu0 %v31_v40 }
  0x22   :  { %737 = vmatpush.bf16.msrb.mxu0 %v1293_v30  ;;  %706 = vmatmul.bf16.vlgmr.msra.gmra.mxu1 %v32_v41  ;;  %v1318_v30 = vld [vmem:[%s1659_s1 + $0x200] sm:$0xff] }
  0x23   :  { %750 = vmatpush.bf16.msrb.mxu1 %v1301_v31  ;;  %719 = vmatmul.bf16.vlgmr.msra.gmra.mxu2 %v33_v44  ;;  %v1326_v31 = vld [vmem:[%s1659_s1 + $0x240] sm:$0xff] }
  0x24   :  { %763 = vmatpush.bf16.msrb.mxu2 %v1309_v35  ;;  %732 = vmatmul.bf16.vlgmr.msra.gmra.mxu3 %v34_v45  ;;  %v40_v35 = vpack.c.bf16 %v30_v33, %v30_v33  ;;  %v1336_v44 = vld [vmem:[%s1660_s2] ss:$0 sm:$0xff] }
  0x25   :  { %776 = vmatpush.bf16.msrb.mxu3 %v1317_v37 }
  0x26   :  { %738 = vmatpush.bf16.msrb.mxu0 %v1292_v42 }
  0x27   :  { %751 = vmatpush.bf16.msrb.mxu1 %v1300_v43 }
  0x28   :  { %764 = vmatpush.bf16.msrb.mxu2 %v1308_v46 }
  0x29   :  { %777 = vmatpush.bf16.msrb.mxu3 %v1316_v47 }
  0x2a   :  { %739 = vmatpush.bf16.msrb.mxu0 %v1291_v48 }
  0x2b   :  { %752 = vmatpush.bf16.msrb.mxu1 %v1299_v49 }
  0x2c   :  { %765 = vmatpush.bf16.msrb.mxu2 %v1307_v50 }
  0x2d   :  { %778 = vmatpush.bf16.msrb.mxu3 %v1315_v51 }
  0x2e   :  { %740 = vmatpush.bf16.msrb.mxu0 %v1290_v52 }
  0x2f   :  { %753 = vmatpush.bf16.msrb.mxu1 %v1298_v53 }
  0x30   :  { %766 = vmatpush.bf16.msrb.mxu2 %v1306_v54 }
  0x31   :  { %779 = vmatpush.bf16.msrb.mxu3 %v1314_v55 }
  0x32   :  { %741 = vmatpush.bf16.msrb.mxu0 %v1289_v56 }
  0x33   :  { %754 = vmatpush.bf16.msrb.mxu1 %v1297_v57 }
  0x34   :  { %767 = vmatpush.bf16.msrb.mxu2 %v1305_v58 }
  0x35   :  { %780 = vmatpush.bf16.msrb.mxu3 %v1313_v59 }
  0x36   :  { %742 = vmatpush.bf16.msrb.mxu0 %v1288_v60 }
  0x37   :  { %755 = vmatpush.bf16.msrb.mxu1 %v1296_v61 }
  0x38   :  { %768 = vmatpush.bf16.msrb.mxu2 %v1304_v62 }
  0x39   :  { %781 = vmatpush.bf16.msrb.mxu3 %v1312_v63 }
  0x3a   :  { %743 = vmatpush.bf16.msrb.mxu0 %v1287_v0 }
  0x3b   :  { %756 = vmatpush.bf16.msrb.mxu1 %v1295_v1 }
  0x3c   :  { %769 = vmatpush.bf16.msrb.mxu2 %v1303_v2 }
  0x3d   :  { %782 = vmatpush.bf16.msrb.mxu3 %v1311_v3 }
  0x3e   :  { %744 = vmatpush.bf16.msrb.mxu0 %v1286_v4 }
  0x3f   :  { %757 = vmatpush.bf16.msrb.mxu1 %v1294_v5 }
  0x40   :  { %770 = vmatpush.bf16.msrb.mxu2 %v1302_v10 }
  0x41   :  { %783 = vmatpush.bf16.msrb.mxu3 %v1310_v11  ;;  %745 = vmatmul.bf16.vlgmr.msrb.gmra.mxu0 %v35_v13 }
  0x42   :  { %789 = vmatpush.bf16.msra.mxu0 %v1325_v8  ;;  %758 = vmatmul.bf16.vlgmr.msrb.gmra.mxu1 %v36_v15 }
  0x43   :  { %802 = vmatpush.bf16.msra.mxu1 %v1333_v9  ;;  %771 = vmatmul.bf16.vlgmr.msrb.gmra.mxu2 %v37_v18  ;;  %v1334_v18 = vld [vmem:[%s1663_s3] sm:$0xff] }
  0x44   :  { %784 = vmatmul.bf16.vlgmr.msrb.gmra.mxu3 %v38_v19  ;;  %890 = vmatpush.bf16.msra.mxu2 %v1335_v14 }
  0x46   :  { %790 = vmatpush.bf16.msra.mxu0 %v1324_v16 }
  0x47   :  { %803 = vmatpush.bf16.msra.mxu1 %v1332_v17 }
  0x48   :  { %891 = vmatpush.bf16.msra.mxu2 %v1334_v18 }
  0x4a   :  { %791 = vmatpush.bf16.msra.mxu0 %v1323_v20 }
  0x4b   :  { %804 = vmatpush.bf16.msra.mxu1 %v1331_v21 }
  0x4e   :  { %792 = vmatpush.bf16.msra.mxu0 %v1322_v22 }
  0x4f   :  { %805 = vmatpush.bf16.msra.mxu1 %v1330_v23 }
  0x52   :  { %793 = vmatpush.bf16.msra.mxu0 %v1321_v24 }
  0x53   :  { %806 = vmatpush.bf16.msra.mxu1 %v1329_v25 }
  0x56   :  { %794 = vmatpush.bf16.msra.mxu0 %v1320_v26 }
  0x57   :  { %807 = vmatpush.bf16.msra.mxu1 %v1328_v27 }
  0x5a   :  { %795 = vmatpush.bf16.msra.mxu0 %v1319_v28 }
  0x5b   :  { %808 = vmatpush.bf16.msra.mxu1 %v1327_v29 }
  0x5e   :  { %796 = vmatpush.bf16.msra.mxu0 %v1318_v30 }
  0x5f   :  { %809 = vmatpush.bf16.msra.mxu1 %v1326_v31 }
  0x61   :  { %797 = vmatmul.bf16.vlgmr.msra.gmra.mxu0 %v39_v34 }
  0x62   :  { %810 = vmatmul.bf16.vlgmr.msra.gmra.mxu1 %v40_v35 }
  0x9e   :  { %v694_v36 = vpop.f32.mrf.mxu0 }
  0x9f   :  { %v707_v37 = vpop.f32.mrf.mxu1  ;;  %v695_v45 = vadd.f32 %v1336_v44, %v694_v36 }
  0xa1   :  { %v708_v48 = vadd.f32 %v707_v37, %v695_v45  ;;  %v1337_v45 = vld [vmem:[%s1662_s4] ss:$0 sm:$0xff] }
  0xa6   :  { %v720_v38 = vpop.f32.mrf.mxu2  ;;  %v696_v40 = vpop.f32.mrf.mxu0 }
  0xa7   :  { %v733_v39 = vpop.f32.mrf.mxu3  ;;  %v709_v41 = vpop.f32.mrf.mxu1  ;;  %v721_v49 = vadd.f32 %v720_v38, %v708_v48 }
  0xa9   :  { %v734_v54 = vadd.f32 %v733_v39, %v721_v49 }
  0xae   :  { %v722_v42 = vpop.f32.mrf.mxu2 }
  0xaf   :  { %v735_v43 = vpop.f32.mrf.mxu3 }
  0xbe   :  { %v746_v46 = vpop.f32.mrf.mxu0 }
  0xbf   :  { %v759_v47 = vpop.f32.mrf.mxu1  ;;  %v747_v55 = vadd.f32 %v746_v46, %v734_v54 }
  0xc1   :  { %v760_v58 = vadd.f32 %v759_v47, %v747_v55 }
  0xc6   :  { %v748_v50 = vpop.f32.mrf.mxu0  ;;  %v772_v52 = vpop.f32.mrf.mxu2 }
  0xc7   :  { %v761_v51 = vpop.f32.mrf.mxu1  ;;  %v785_v53 = vpop.f32.mrf.mxu3  ;;  %v773_v59 = vadd.f32 %v772_v52, %v760_v58 }
  0xc9   :  { %v786_v60 = vadd.f32 %v785_v53, %v773_v59 }
  0xce   :  { %v774_v56 = vpop.f32.mrf.mxu2 }
  0xcf   :  { %v787_v57 = vpop.f32.mrf.mxu3 }
  0xde   :  { %v798_v61 = vpop.f32.mrf.mxu0 }
  0xdf   :  { %v811_v62 = vpop.f32.mrf.mxu1  ;;  %v799_v63 = vadd.f32 %v798_v61, %v786_v60 }
  0xe1   :  { %v812_v0 = vadd.f32 %v811_v62, %v799_v63 }
  0xe3   :  { %v816_v1 = vmul.f32 0.70710677, %v812_v0  ;;  %v815_v41 = vmul.f32 0.5, %v812_v0 }
  0xe5   :  { %v817_v2 = vmul.f32 %v816_v1, %v816_v1 }
  0xe6   :  { %v800_v3 = vpop.f32.mrf.mxu0 }
  0xe7   :  { %v813_v4 = vpop.f32.mrf.mxu1  ;;  %v818_v5 = vmin.f32 %v817_v2, 16.0 }
  0xe9   :  { %v819_v6 = vmul.f32 2.1237322e-06, %v818_v5  ;;  %v830_v7 = vmul.f32 3.8918573e-05, %v818_v5 }
  0xeb   :  { %v820_v8 = vadd.f32 0.00028619796, %v819_v6  ;;  %v831_v9 = vadd.f32 0.001143296, %v830_v7 }
  0xed   :  { %v821_v10 = vmul.f32 %v820_v8, %v818_v5  ;;  %v832_v11 = vmul.f32 %v831_v9, %v818_v5 }
  0xef   :  { %v833_v12 = vadd.f32 0.014752088, %v832_v11  ;;  %v822_v13 = vadd.f32 0.0036580483, %v821_v10 }
  0xf1   :  { %v834_v15 = vmul.f32 %v833_v12, %v818_v5  ;;  %v823_v17 = vmul.f32 %v822_v13, %v818_v5 }
  0xf3   :  { %v835_v16 = vadd.f32 0.112945676, %v834_v15  ;;  %v824_v21 = vadd.f32 0.05243302, %v823_v17 }
  0xf5   :  { %v836_v19 = vmul.f32 %v835_v16, %v818_v5  ;;  %v825_v24 = vmul.f32 %v824_v21, %v818_v5 }
  0xf7   :  { %v837_v20 = vadd.f32 0.4994258, %v836_v19  ;;  %v826_v25 = vadd.f32 0.18741608, %v825_v24 }
  0xf9   :  { %v838_v22 = vmul.f32 %v837_v20, %v818_v5  ;;  %v827_v27 = vmul.f32 %v826_v25, %v818_v5 }
  0xfb   :  { %v839_v23 = vadd.f32 1.0, %v838_v22  ;;  %v828_v31 = vadd.f32 1.1283791, %v827_v27 }
  0xfd   :  { %1338 = vrcp.f32 %v839_v23  ;;  %v851_v30 = vand.u32 2147483648, %v839_v23  ;;  %v849_v33 = vand.u32 2147483647, %v839_v23  ;;  %vm845_vm1 = vweird.f32 %v839_v23 }
  0xfe   :  { %v829_v36 = vmul.f32 %v828_v31, %v816_v1 }
  0xff   :  { %v852_v35 = vor.u32 1.1754944e-38, %v851_v30  ;;  %vm850_vm3 = vcmp.eq.f32.partialorder %v849_v33, 8.507059e+37 }
 0x103   :  { %v1339_v26 = vpop.eup %1338 }
 0x104   :  { %v841_v28 = vmul.f32 %v1339_v26, %v839_v23  ;;  %vm846_vm0 = vweird.f32 %v1339_v26 }
 0x105   :  { %vm847_vm2 = vmor %vm845_vm1, %vm846_vm0 }
 0x106   :  { %v842_v29 = vsub.f32 1.0, %v841_v28 }
 0x108   :  { %v843_v32 = vmul.f32 %v1339_v26, %v842_v29 }
 0x10a   :  { %v844_v34 = vadd.f32 %v1339_v26, %v843_v32 }
 0x10c   :  { %v848_v37 = vsel %vm847_vm2, %v1339_v26, %v844_v34 }
 0x10d   :  { %v853_v38 = vsel %vm850_vm3, %v852_v35, %v848_v37 }
 0x10e   :  { %v854_v39 = vmul.f32 %v853_v38, %v829_v36 }
 0x110   :  { %v1244_v40 = vclamps-f32 %v854_v39, 1.0 }
 0x112   :  { %v857_v42 = vadd.f32 1.0, %v1244_v40 }
 0x114   :  { %v858_v43 = vmul.f32 %v857_v42, %v815_v41 }
 0x116   :  { %v859_v44 = vpack.c.bf16 %v858_v43, %v858_v43 }
 0x118   :  { %1253 = vmatmul.msk.bf16.vlgmr.msra.gmra.mxu2 %vm880_vm4, %v859_v44 }
 0x19b   :  { %v893_v46 = vpop.f32.mrf.mxu2 }
 0x19c   :  { %v894_v47 = vadd.f32 %v1337_v45, %v893_v46 }
 0x19e   :  { %897 = vmax.xlane.f32.xlu0 %v894_v47 }
 0x1a3   :  { %v895_v48 = vpop.f32.mrf.mxu2 }
 0x211   :  { %v898_v49 = vpop.xlane.xlu0 %897 }
 0x212   :  { %v899_v50 = vsub.f32 %v894_v47, %v898_v49 }
 0x214   :  { %v900_v51 = vmul.f32 1.442695, %v899_v50 }
 0x216   :  { %1340 = vpow2.f32 %v900_v51 }
 0x21c   :  { %v1341_v52 = vpop.eup %1340 }
 0x21d   :  { %902 = vadd.xlane.f32.xlu0 %v1341_v52 }
 0x290   :  { %v903_v53 = vpop.xlane.xlu0 %902 }
 0x291   :  { %1342 = vrcp.f32 %v903_v53  ;;  %v915_v57 = vand.u32 2147483648, %v903_v53  ;;  %v913_v59 = vand.u32 2147483647, %v903_v53  ;;  %vm909_vm6 = vweird.f32 %v903_v53 }
 0x293   :  { %v916_v61 = vor.u32 1.1754944e-38, %v915_v57  ;;  %vm914_vm8 = vcmp.eq.f32.partialorder %v913_v59, 8.507059e+37 }
 0x297   :  { %v1343_v54 = vpop.eup %1342 }
 0x298   :  { %v905_v55 = vmul.f32 %v1343_v54, %v903_v53  ;;  %vm910_vm5 = vweird.f32 %v1343_v54 }
 0x299   :  { %vm911_vm7 = vmor %vm909_vm6, %vm910_vm5 }
 0x29a   :  { %v906_v56 = vsub.f32 1.0, %v905_v55 }
 0x29c   :  { %v907_v58 = vmul.f32 %v1343_v54, %v906_v56 }
 0x29e   :  { %v908_v60 = vadd.f32 %v1343_v54, %v907_v58 }
 0x2a0   :  { %v912_v62 = vsel %vm911_vm7, %v1343_v54, %v908_v60 }
 0x2a1   :  { %v917_v63 = vsel %vm914_vm8, %v916_v61, %v912_v62 }
 0x2a2   :  { %v918_v0 = vmul.f32 %v1341_v52, %v917_v63 }
 0x2a4   :  { %919 = vst [vmem:[%s1664_s5] sm:$0xff] %v918_v0 }

</bundles_post_ra>
